<compile_context>
chip_gen: v7x
topology: tpu7x:2x2x1
jax: 0.10.0
libtpu: 0.0.40
codegen_flags: <defaults>
</compile_context>

<pallas_src>
import functools

import numpy as np

import jax
import jax.numpy as jnp
from jax.experimental import pallas as pl
from jax.experimental.pallas import tpu as pltpu


# ----------------------------------------------------------------------------
# Tile helpers
# ----------------------------------------------------------------------------
_SMALL_LINEAR_BYTES = 4 * 1024 * 1024  # single-block fast path budget (fits all gens)


def _batch_tile(total, bytes_per_item, target_bytes=2 << 20, cap=512):
    """Batch tile: big enough to amortize the ~0.35us per-grid-step overhead,
    a divisor of `total`, and (when < total) a multiple of 8 so the sublane
    constraint on 2-D blocks holds."""
    want = max(1, target_bytes // max(1, int(bytes_per_item)))
    want = min(total, want, cap)
    if want >= total:
        return total
    t = (want // 8) * 8
    while t >= 8:
        if total % t == 0:
            return t
        t -= 8
    return total  # fallback: whole batch in one block (always legal)


def _pick_contract_tile(K, pref):
    """K tile must divide K exactly (padding a contraction dim is unsafe)."""
    if K <= pref:
        return K
    t = (pref // 128) * 128
    while t >= 128:
        if K % t == 0:
            return t
        t -= 128
    return K  # fallback: full-K blocks (correct; only costs VMEM)


def _pick_par_tile(dim, pref, align):
    """Tile for a non-contracted dim; ragged last block is fine (OOB writes dropped)."""
    if dim <= pref:
        return dim
    return max(align, (pref // align) * align)


# ----------------------------------------------------------------------------
# Kernel A: y = bias + x @ W       (x: (M, K), W: (K, N), bias row: (1, N))
# ----------------------------------------------------------------------------
def _linear_bias_small_kernel(x_ref, w_ref, b_ref, o_ref):
    acc = jnp.dot(x_ref[...], w_ref[...], preferred_element_type=jnp.float32)
    o_ref[...] = (acc + b_ref[...].astype(jnp.float32)).astype(o_ref.dtype)


def _linear_bias_tiled_kernel(x_ref, w_ref, b_ref, o_ref, acc_ref):
    @pl.when(pl.program_id(2) == 0)
    def _init():
        acc_ref[...] = jnp.zeros_like(acc_ref)

    acc_ref[...] += jnp.dot(x_ref[...], w_ref[...],
                            preferred_element_type=jnp.float32)

    @pl.when(pl.program_id(2) == pl.num_programs(2) - 1)
    def _finalize():
        o_ref[...] = (acc_ref[...] + b_ref[...].astype(jnp.float32)).astype(o_ref.dtype)


def _linear_bias_single_block(x, w_t, b_row):
    M, K = x.shape
    N = w_t.shape[1]
    return pl.pallas_call(
        _linear_bias_small_kernel,
        out_shape=jax.ShapeDtypeStruct((M, N), x.dtype),
        grid_spec=pltpu.PrefetchScalarGridSpec(
            num_scalar_prefetch=0,
            grid=(1,),
            in_specs=[
                pl.BlockSpec((M, K), lambda i: (0, 0)),
                pl.BlockSpec((K, N), lambda i: (0, 0)),
                pl.BlockSpec((1, N), lambda i: (0, 0)),
            ],
            out_specs=pl.BlockSpec((M, N), lambda i: (0, 0)),
        ),
    )(x, w_t, b_row)


def _linear_bias_tiled(x, w_t, b_row, *, tm, tn, tk):
    M, K = x.shape
    N = w_t.shape[1]
    tm = _pick_par_tile(M, tm, 8)      # MXU-filling row tile (>=128 by default)
    tn = _pick_par_tile(N, tn, 128)    # 256-wide column tile (lane-dense output)
    tk = _pick_contract_tile(K, tk)    # K-tiling decouples VMEM from K
    grid = (pl.cdiv(M, tm), pl.cdiv(N, tn), K // tk)
    return pl.pallas_call(
        _linear_bias_tiled_kernel,
        out_shape=jax.ShapeDtypeStruct((M, N), x.dtype),
        grid_spec=pltpu.PrefetchScalarGridSpec(
            num_scalar_prefetch=0,
            grid=grid,
            in_specs=[
                pl.BlockSpec((tm, tk), lambda i, j, k: (i, k)),
                pl.BlockSpec((tk, tn), lambda i, j, k: (k, j)),
                pl.BlockSpec((1, tn), lambda i, j, k: (0, j)),
            ],
            out_specs=pl.BlockSpec((tm, tn), lambda i, j, k: (i, j)),
            scratch_shapes=[pltpu.VMEM((tm, tn), jnp.float32)],
        ),
        compiler_params=pltpu.CompilerParams(
            dimension_semantics=("parallel", "parallel", "arbitrary")),
    )(x, w_t, b_row)


def linear_bias(x, w_t, bias, *, tm=256, tn=256, tk=512):
    """y = bias + x @ w_t   with w_t: (K, N) (weight already transposed once)."""
    M, K = x.shape
    K2, N = w_t.shape
    assert K == K2
    b_row = bias.reshape(1, N) if bias.ndim == 1 else bias
    assert b_row.shape == (1, N)
    itemsize = max(int(jnp.dtype(x.dtype).itemsize), 4)
    total_bytes = (M * K + K * N + M * N + N) * itemsize
    if total_bytes <= _SMALL_LINEAR_BYTES:
        # Tiny problem: one block covering everything — no grid/pipeline overhead.
        return _linear_bias_single_block(x, w_t, b_row)
    return _linear_bias_tiled(x, w_t, b_row, tm=tm, tn=tn, tk=tk)


# ----------------------------------------------------------------------------
# Kernel C: 3-D projector   y[g] = bias[g] + W[g] @ x[g]
#   W: (G, N, M), x: (G, M) -> y: (G, N)   (many groups per step, lane-dense out)
# ----------------------------------------------------------------------------
def _bmv_bias_kernel(w_ref, x_ref, b_ref, o_ref):
    w = w_ref[...].astype(jnp.float32)        # (Gb, N, M)
    xv = x_ref[...].astype(jnp.float32)       # (Gb, M)
    y = jnp.sum(w * xv[:, None, :], axis=-1)  # (Gb, N)  HBM-bound: VPU mul + lane reduce
    o_ref[...] = (y + b_ref[...].astype(jnp.float32)).astype(o_ref.dtype)


def batched_matvec_bias(weight, x, bias):
    G, N, M = weight.shape
    assert x.shape == (G, M)
    gb = _batch_tile(G, N * M * jnp.dtype(weight.dtype).itemsize)
    if bias.ndim == 1:
        assert bias.shape == (N,)
        bias2 = bias.reshape(1, N)
        b_spec = pl.BlockSpec((1, N), lambda g: (0, 0))
    else:
        assert bias.shape == (G, N)
        bias2 = bias
        b_spec = pl.BlockSpec((gb, N), lambda g: (g, 0))
    return pl.pallas_call(
        _bmv_bias_kernel,
        out_shape=jax.ShapeDtypeStruct((G, N), x.dtype),
        grid_spec=pltpu.PrefetchScalarGridSpec(
            num_scalar_prefetch=0,
            grid=(G // gb,),
            in_specs=[
                pl.BlockSpec((gb, N, M), lambda g: (g, 0, 0)),
                pl.BlockSpec((gb, M), lambda g: (g, 0)),
                b_spec,
            ],
            out_specs=pl.BlockSpec((gb, N), lambda g: (g, 0)),
        ),
        compiler_params=pltpu.CompilerParams(dimension_semantics=("parallel",)),
    )(weight, x, bias2)


# ----------------------------------------------------------------------------
# Kernel B: fused LDR-PM step
#   inputs : G (B, m, d), y_eq (B, d), h (1, m), y_LDR (B, d), s_LDR (B, m)
#   outputs: y_star (B, d), s_star (B, m), alpha (B, 1)
# ----------------------------------------------------------------------------
def _ldr_step_kernel(g_ref, yeq_ref, h_ref, yl_ref, sl_ref,
                     ystar_ref, sstar_ref, alpha_ref, *, eps):
    g = g_ref[...].astype(jnp.float32)               # (Gb, m, d)
    y_eq = yeq_ref[...].astype(jnp.float32)          # (Gb, d)
    gy = jnp.sum(g * y_eq[:, None, :], axis=-1)      # (Gb, m)  per-sample matvec
    s_eq = h_ref[...].astype(jnp.float32) - gy       # (Gb, m)
    s_l = sl_ref[...].astype(jnp.float32)            # (Gb, m)
    s = jnp.maximum(s_l - s_eq, eps)
    alphas = -s_eq / s
    masked = jnp.where(s_eq < 0.0, alphas, 0.0)
    alpha = jnp.max(masked, axis=-1, keepdims=True)  # (Gb, 1)
    one_m = 1.0 - alpha
    ystar_ref[...] = (yl_ref[...].astype(jnp.float32) * alpha
                      + y_eq * one_m).astype(ystar_ref.dtype)
    sstar_ref[...] = (s_l * alpha + s_eq * one_m).astype(sstar_ref.dtype)
    alpha_ref[...] = alpha.astype(alpha_ref.dtype)


def ldr_pm_lhs_step(G3, y_eq, h, y_ldr, s_ldr, eps):
    B, m, d = G3.shape
    assert y_eq.shape == (B, d) and y_ldr.shape == (B, d) and s_ldr.shape == (B, m)
    h2 = h.reshape(1, m) if h.ndim == 1 else h
    assert h2.shape == (1, m)
    gb = _batch_tile(B, m * d * jnp.dtype(G3.dtype).itemsize)
    kernel = functools.partial(_ldr_step_kernel, eps=float(eps))
    return pl.pallas_call(
        kernel,
        out_shape=(
            jax.ShapeDtypeStruct((B, d), y_eq.dtype),
            jax.ShapeDtypeStruct((B, m), y_eq.dtype),
            jax.ShapeDtypeStruct((B, 1), jnp.float32),
        ),
        grid_spec=pltpu.PrefetchScalarGridSpec(
            num_scalar_prefetch=0,
            grid=(B // gb,),
            in_specs=[
                pl.BlockSpec((gb, m, d), lambda b: (b, 0, 0)),
                pl.BlockSpec((gb, d), lambda b: (b, 0)),
                pl.BlockSpec((1, m), lambda b: (0, 0)),
                pl.BlockSpec((gb, d), lambda b: (b, 0)),
                pl.BlockSpec((gb, m), lambda b: (b, 0)),
            ],
            out_specs=(
                pl.BlockSpec((gb, d), lambda b: (b, 0)),
                pl.BlockSpec((gb, m), lambda b: (b, 0)),
                pl.BlockSpec((gb, 1), lambda b: (b, 0)),
            ),
        ),
        compiler_params=pltpu.CompilerParams(dimension_semantics=("parallel",)),
    )(G3, y_eq, h2, y_ldr, s_ldr)


# ----------------------------------------------------------------------------
# Projector (mirrors the PyTorch module; 2-D path -> Kernel A, 3-D -> Kernel C)
# ----------------------------------------------------------------------------
class Projector:
    def __init__(self, weight, bias=None, bias_transform=None):
        self.bias = None
        self.bias_transform = None
        if bias is not None:
            assert bias_transform is None
            self.bias = jnp.asarray(bias)
        if bias_transform is not None:
            assert bias is None
            # torch `.t()` swaps the last two axes of a matrix; use swapaxes so
            # a 3-D tensor is not fully reversed.
            self.bias_transform = jnp.swapaxes(jnp.asarray(bias_transform), -1, -2)
        self.weight = jnp.swapaxes(jnp.asarray(weight), -1, -2)

    def forward(self, x):
        assert self.bias is not None, "bias not set (call update_bias first)"
        if self.weight.ndim == 3:
            return batched_matvec_bias(self.weight, x, self.bias)
        return linear_bias(x, self.weight, self.bias)

    __call__ = forward

    # --- host-side bookkeeping updates (plain XLA, not the hot forward path) ---
    def update_bias(self, b):
        assert self.bias_transform is not None
        if self.bias_transform.ndim == 3:
            self.bias = jnp.einsum("gnm,gm->gn", self.bias_transform, b)
        else:
            self.bias = b @ self.bias_transform

    def update_weight_and_bias_transform(self, A, bsz):
        # TODO(synk): torch.inverse-based reconstruction kept as plain XLA ops.
        A = jnp.asarray(A)
        rs, cs = A.shape[0] // bsz, A.shape[1] // bsz
        weights, bts = [], []
        for i in range(bsz):
            A_i = A[i * rs:(i + 1) * rs, i * cs:(i + 1) * cs]
            PD_i = A_i @ A_i.T
            chunk_i = A_i.T @ jnp.linalg.inv(PD_i)
            weights.append(jnp.eye(A_i.shape[-1], dtype=A.dtype) - chunk_i @ A_i)
            bts.append(chunk_i)
        self.weight = jnp.stack(weights, axis=0)
        self.bias_transform = jnp.stack(bts, axis=0)


# ----------------------------------------------------------------------------
# LDRPMLHS
# ----------------------------------------------------------------------------
class LDRPMLHS:
    def __init__(self, h, eq_weight, eq_bias, ldr_weight, ldr_bias, S_scale,
                 nonnegative_mask):
        self.name = "LDRPMLHS"
        self.h = jnp.asarray(h)
        self.eq_projector = Projector(weight=eq_weight, bias=eq_bias)
        self.ldr_projector = Projector(weight=ldr_weight, bias=ldr_bias)
        self.ldr_bias = jnp.asarray(ldr_bias)
        self.ldr_weight = jnp.asarray(ldr_weight).T
        self.S_scale = jnp.asarray(S_scale)
        mask = np.asarray(nonnegative_mask).astype(bool)
        self.nonnegative_mask = jnp.asarray(mask)
        # Static gather indices (the mask is a fixed buffer -> compute once).
        self._neg_idx = jnp.asarray(np.nonzero(~mask)[0], dtype=jnp.int32)
        self._pos_idx = jnp.asarray(np.nonzero(mask)[0], dtype=jnp.int32)
        self.x_LDR = self.ldr_bias

    def update_ldr_ref(self, features):
        # Linear part goes through the Pallas linear+bias kernel; the quadratic
        # form stays in XLA (bookkeeping, not the hot forward path).
        eq_part = linear_bias(features, self.ldr_weight, self.ldr_bias)
        ones_features = jnp.concatenate(
            [jnp.ones((features.shape[0], 1), features.dtype), features], axis=1)
        ineq_part = jnp.einsum("bd,ndm->bnm", ones_features, self.S_scale)
        ineq_part = jnp.einsum("bnm,bm->bn", ineq_part, ones_features)
        self.x_LDR = jnp.concatenate([eq_part, ineq_part], axis=1)

    def forward(self, x, G):
        x = jnp.asarray(x)
        G = jnp.asarray(G)
        # TODO(synk): boolean-mask column selection / final concat stay as XLA
        # gather/concat (static indices precomputed at construction).
        y = jnp.take(x, self._neg_idx, axis=1)
        y_eq = self.eq_projector(y)                                 # Kernel A
        y_ldr = jnp.take(self.x_LDR, self._neg_idx, axis=1)
        s_ldr = jnp.take(self.x_LDR, self._pos_idx, axis=1)
        eps = float(jnp.finfo(x.dtype).eps)
        y_star, s_star, alpha = ldr_pm_lhs_step(G, y_eq, self.h, y_ldr, s_ldr, eps)  # Kernel B
        self.alpha = alpha.reshape(-1)
        return jnp.concatenate([y_star, s_star], axis=1)

    __call__ = forward


# ----------------------------------------------------------------------------
# Demo / correctness checks
# ----------------------------------------------------------------------------
if __name__ == "__main__":
    key = jax.random.PRNGKey(0)
    ks = jax.random.split(key, 16)

    # --------------------- LDRPMLHS forward (small shapes) -------------------
    B, d_eq, m_ineq, F = 4, 32, 16, 24
    D_total = d_eq + m_ineq

    eq_weight = 0.1 * jax.random.normal(ks[0], (d_eq, d_eq), jnp.float32)
    eq_bias = 0.1 * jax.random.normal(ks[1], (d_eq,), jnp.float32)
    ldr_weight = 0.1 * jax.random.normal(ks[2], (d_eq, F), jnp.float32)
    ldr_bias = 0.1 * jax.random.normal(ks[3], (d_eq,), jnp.float32)
    S_scale = 0.1 * jax.random.normal(ks[4], (m_ineq, F + 1, F + 1), jnp.float32)
    h = 1.0 + jax.random.uniform(ks[5], (m_ineq,), jnp.float32)
    nonnegative_mask = jnp.asarray(np.array([False] * d_eq + [True] * m_ineq))

    model = LDRPMLHS(h, eq_weight, eq_bias, ldr_weight, ldr_bias, S_scale,
                     nonnegative_mask)

    features = jax.random.normal(ks[6], (B, F), jnp.float32)
    model.update_ldr_ref(features)

    x = jax.random.normal(ks[7], (B, D_total), jnp.float32)
    G = 0.2 * jax.random.normal(ks[8], (B, m_ineq, d_eq), jnp.float32)

    x_star = jax.block_until_ready(model.forward(x, G))
    assert x_star.shape == (B, D_total)

    # Reference (hierarchical): validate the linear kernel against a
    # highest-precision jnp matmul, then validate the fused step against jnp
    # applied to the kernel's own y_eq (avoids MXU-default-precision drift).
    neg, pos = model._neg_idx, model._pos_idx
    y_in = x[:, neg]
    y_eq_ref = model.eq_projector.bias + jnp.dot(
        y_in, model.eq_projector.weight, precision=jax.lax.Precision.HIGHEST)
    y_eq_k = model.eq_projector(y_in)
    assert jnp.allclose(y_eq_k, y_eq_ref, atol=2e-2, rtol=2e-2)

    eps = float(jnp.finfo(x.dtype).eps)
    s_eq_r = h - jnp.sum(G * y_eq_k[:, None, :], axis=-1)
    y_l = model.x_LDR[:, neg]
    s_l = model.x_LDR[:, pos]
    s_r = jnp.maximum(s_l - s_eq_r, eps)
    alphas_r = -s_eq_r / s_r
    alpha_r = jnp.max(jnp.where(s_eq_r < 0, alphas_r, 0.0), axis=-1, keepdims=True)
    y_star_r = y_l * alpha_r + y_eq_k * (1.0 - alpha_r)
    s_star_r = s_l * alpha_r + s_eq_r * (1.0 - alpha_r)
    x_star_r = jnp.concatenate([y_star_r, s_star_r], axis=1)
    assert jnp.allclose(x_star, x_star_r, atol=1e-4, rtol=1e-4)
    assert jnp.allclose(model.alpha, alpha_r[:, 0], atol=1e-4, rtol=1e-4)

    # ------------- improved 3-D Projector path (batched matvec + bias) -------
    Gg, Nn = 16, 64
    w3 = 0.1 * jax.random.normal(ks[9], (Gg, Nn, Nn), jnp.float32)
    b3 = 0.1 * jax.random.normal(ks[10], (Gg, Nn), jnp.float32)
    x3 = jax.random.normal(ks[11], (Gg, Nn), jnp.float32)
    p3 = Projector.__new__(Projector)   # state as set by update_weight_and_bias_transform
    p3.weight, p3.bias, p3.bias_transform = w3, b3, None
    y3 = jax.block_until_ready(p3(x3))
    y3_ref = b3 + jnp.sum(w3 * x3[:, None, :], axis=-1)
    assert y3.shape == (Gg, Nn)
    assert jnp.allclose(y3, y3_ref, atol=1e-4, rtol=1e-4)

    # ------------- tiled 2-D path smoke test (K-tiling + 256-wide tiles) ------
    M2, K2, N2 = 512, 1024, 512
    xt = jax.random.normal(ks[12], (M2, K2), jnp.float32)
    wt = jax.random.normal(ks[13], (N2, K2), jnp.float32) / np.sqrt(K2)
    bt = jax.random.normal(ks[14], (N2,), jnp.float32)
    p2 = Projector(wt, bias=bt)
    yt = jax.block_until_ready(p2(xt))
    yt_ref = bt + jnp.dot(xt, wt.T, precision=jax.lax.Precision.HIGHEST)
    assert yt.shape == (M2, N2)
    assert jnp.allclose(yt, yt_ref, atol=0.5, rtol=2e-2)

    print("KERNEL_OK")
</pallas_src>

<mosaic_0001>
module attributes {stable_mosaic.version = 11 : i64} {
  func.func @_linear_bias_small_kernel(%arg0: i32, %arg1: memref<4x24xf32, #tpu.memory_space<vmem>>, %arg2: memref<24x32xf32, #tpu.memory_space<vmem>>, %arg3: memref<1x32xf32, #tpu.memory_space<vmem>>, %arg4: memref<4x32xf32, #tpu.memory_space<vmem>>) attributes {dimension_semantics = [#tpu.dimension_semantics<arbitrary>], iteration_bounds = array<i64: 1>, scalar_prefetch = 0 : i64, scratch_operands = 0 : i64, tpu.core_type = #tpu.core_type<tc>, window_params = [{pipeline_mode = #tpu.pipeline_mode<synchronous>, transform_indices = @transform_0, window_bounds = array<i64: 4, 24>}, {pipeline_mode = #tpu.pipeline_mode<synchronous>, transform_indices = @transform_1, window_bounds = array<i64: 24, 32>}, {pipeline_mode = #tpu.pipeline_mode<synchronous>, transform_indices = @transform_2, window_bounds = array<i64: 1, 32>}, {pipeline_mode = #tpu.pipeline_mode<synchronous>, transform_indices = @transform_3, window_bounds = array<i64: 4, 32>}]} {
    %c0 = arith.constant 0 : index
    %c0_0 = arith.constant 0 : index
    %0 = vector.load %arg1[%c0, %c0_0] : memref<4x24xf32, #tpu.memory_space<vmem>>, vector<4x24xf32>
    %c0_1 = arith.constant 0 : index
    %c0_2 = arith.constant 0 : index
    %1 = vector.load %arg2[%c0_1, %c0_2] : memref<24x32xf32, #tpu.memory_space<vmem>>, vector<24x32xf32>
    %cst = arith.constant dense<0.000000e+00> : vector<4x32xf32>
    %2 = tpu.matmul %0, %1, %cst {dimension_numbers = #tpu.dot_dimension_numbers<[1], [0], [0], [1], [0, 0, 1, 1], [], []>} : vector<4x24xf32>, vector<24x32xf32>, vector<4x32xf32> -> vector<4x32xf32>
    %c0_3 = arith.constant 0 : index
    %c0_4 = arith.constant 0 : index
    %3 = vector.load %arg3[%c0_3, %c0_4] : memref<1x32xf32, #tpu.memory_space<vmem>>, vector<1x32xf32>
    %4 = vector.broadcast %3 : vector<1x32xf32> to vector<4x32xf32>
    %5 = arith.addf %2, %4 : vector<4x32xf32>
    %c0_5 = arith.constant 0 : index
    %c0_6 = arith.constant 0 : index
    %6 = vector.load %arg4[%c0_5, %c0_6] : memref<4x32xf32, #tpu.memory_space<vmem>>, vector<4x32xf32>
    tpu.vector_store %arg4[%c0_5, %c0_6], %5 {strides = array<i32>} : memref<4x32xf32, #tpu.memory_space<vmem>>, vector<4x32xf32>,
    return
  }
  func.func @transform_0(%arg0: i32) -> (i32, i32) {
    %c0_i32 = arith.constant 0 : i32
    %c0_i32_0 = arith.constant 0 : i32
    %c0_i32_1 = arith.constant 0 : i32
    return %c0_i32, %c0_i32_0 : i32, i32
  }
  func.func @transform_1(%arg0: i32) -> (i32, i32) {
    %c0_i32 = arith.constant 0 : i32
    %c0_i32_0 = arith.constant 0 : i32
    %c0_i32_1 = arith.constant 0 : i32
    return %c0_i32, %c0_i32_0 : i32, i32
  }
  func.func @transform_2(%arg0: i32) -> (i32, i32) {
    %c0_i32 = arith.constant 0 : i32
    %c0_i32_0 = arith.constant 0 : i32
    %c0_i32_1 = arith.constant 0 : i32
    return %c0_i32, %c0_i32_0 : i32, i32
  }
  func.func @transform_3(%arg0: i32) -> (i32, i32) {
    %c0_i32 = arith.constant 0 : i32
    %c0_i32_0 = arith.constant 0 : i32
    %c0_i32_1 = arith.constant 0 : i32
    return %c0_i32, %c0_i32_0 : i32, i32
  }
}

</mosaic_0001>

<bundles_post_ra>
// kernel: tpu_custom_call.1
= control target key start
LH: loop header
LB: loop body
LE: loop exit
PB: predicated region body
PF: predicated region fallthrough
CT: control target
= control target key end

     0   :  { %8 = vsyncpa [#allocation3], 0  ;;  %s316_s0 = inlined_call_operand.hbm [shape: f32[4,24], index: 0, kind: input, shape index: {}]   ;;  %s317_s1 = inlined_call_operand.hbm [shape: f32[24,32], index: 1, kind: input, shape index: {}]   ;;  %s318_s2 = inlined_call_operand.vmem [shape: f32[1,32], index: 2, kind: input, shape index: {}]   ;;  %s319_s3 = inlined_call_operand.hbm [shape: f32[4,32], index: 3, kind: output, shape index: {}]  }
   0x1   :  { %9 = vsyncpa [#allocation6], 0 }
   0x2   :  { %10 = vsyncpa [#allocation4], 0  ;;  %s242_s12 = smov [#allocation2]   ;;  %s243_s14 = smov [#allocation5]  }
   0x3   :  { %s17_s13 = sshll.u32 %s242_s12, 4  ;;  %s26_s15 = sshll.u32 %s243_s14, 4  ;;  %s18_s13 = int_to_ptr.vmem [resolvable:$true] %s17_s13  ;;  %s270_s15 = int_to_ptr.vmem [resolvable:$true] %s26_s15 }
   0x4   :  { %s170_s18 = scalar_lea.hbm %s316_s0, 64 }
   0x5   :  { %p171_p0 = scmp.ne.s32.totalorder %s316_s0, %s170_s18  ;;  %p174_p1 = scmp.lt.u32.totalorder %s170_s18, %s316_s0 }
   0x7   :  { %p176_p2 = pnand %p174_p1, %p171_p0 }
   0x9   :  { %179 = shalt.err (!%p176_p2)
}
   0xa   :  { %s180_s23 = scalar_lea.vmem %s18_s13, 64  ;;  %p185_p4 = scmp.lt.s32.totalorder %s18_s13, %s18_s13 }
   0xb   :  { %p181_p3 = scmp.ne.s32.totalorder %s18_s13, %s180_s23  ;;  %p186_p5 = scmp.lt.s32.totalorder %s180_s23, %s180_s23 }
   0xd   :  { %p187_p6 = por %p186_p5, %p185_p4 }
   0xf   :  { %p188_p7 = pnand %p187_p6, %p181_p3 }
  0x11   :  { %191 = shalt.err (!%p188_p7)
}
  0x12   :  { %20 = dma.hbm_to_vmem [thread:$0]  %s316_s0, 64, %s18_s13, [#allocation3]  }
  0x13   :  { %s192_s28 = scalar_lea.hbm %s317_s1, 384 }
  0x14   :  { %p193_p8 = scmp.ne.s32.totalorder %s317_s1, %s192_s28  ;;  %p196_p9 = scmp.lt.u32.totalorder %s192_s28, %s317_s1 }
  0x16   :  { %p198_p10 = pnand %p196_p9, %p193_p8 }
  0x18   :  { %201 = shalt.err (!%p198_p10)
}
  0x19   :  { %s202_s6 = scalar_lea.vmem %s270_s15, 384  ;;  %p207_p12 = scmp.lt.s32.totalorder %s270_s15, %s270_s15 }
  0x1a   :  { %p203_p11 = scmp.ne.s32.totalorder %s270_s15, %s202_s6  ;;  %p208_p13 = scmp.lt.s32.totalorder %s202_s6, %s202_s6 }
  0x1c   :  { %p209_p0 = por %p208_p13, %p207_p12 }
  0x1e   :  { %p210_p1 = pnand %p209_p0, %p203_p11 }
  0x20   :  { %213 = shalt.err (!%p210_p1)
}
  0x21   :  { %s244_s0 = smov 128   ;;  %s245_s7 = smov 8  }
  0x22   :  { %32 = dma.hbm_to_vmem [thread:$0]  %s317_s1, 384, %s270_s15, [#allocation6], %s244_s0, %s244_s0, %s245_s7  }
  0x23   :  { %236 = dma.done.wait [#allocation3], 64  }
  0x24   :  { %237 = vsyncadd [#allocation3], 4294967232 }
  0x25   :  { %238 = dma.done.wait [#allocation6], 384  }
  0x26   :  { %239 = vsyncadd [#allocation6], 4294966912  ;;  %v246_v0 = vmov 0.0|0.0   ;;  %vm247_vm0 = vmmov 0   ;;  %v248_v1 = vmov 0.0   ;;  %v42_v2 = vld [vmem:[#allocation5] sm:$0xff] }
  0x27   :  { %159 = vmatprep.subr.bf16.mxu0 %v246_v0  ;;  %156 = vmatprep.mubr.msk.f32.mxu0 %vm247_vm0, %v248_v1  ;;  %v43_v3 = vld [vmem:[#allocation5 + $0x8] sm:$0xff]  ;;  %v44_v5 = vld [vmem:[#allocation5 + $0x10] sm:$0xff]  ;;  %v41_v6 = vld [vmem:[#allocation2] sm:$0xf]  ;;  %vm52_vm1 = vcmask 195584   ;;  %s249_s11 = smov [#allocation7]  }
  0x28   :  { %v160_v4 = vpack.c.bf16 %v43_v3, %v42_v2  ;;  %v144_v7 = vld [vmem:[%s318_s2] ss:$0 sm:$0xff]  ;;  %s134_s12 = sshll.u32 %s249_s11, 4  ;;  %vm126_vm2 = vcmask 257024   ;;  %s135_s12 = int_to_ptr.vmem [resolvable:$true] %s134_s12 }
  0x29   :  { %s214_s13 = scalar_lea.vmem %s135_s12, 64  ;;  %p219_p3 = scmp.lt.s32.totalorder %s135_s12, %s135_s12 }
  0x2a   :  { %161 = vmatpush3.bf16.msra.mxu0 %v160_v4  ;;  %p215_p2 = scmp.ne.s32.totalorder %s135_s12, %s214_s13  ;;  %p220_p4 = scmp.lt.s32.totalorder %s214_s13, %s214_s13 }
  0x2b   :  { %154 = vmatprep.subr.mxu0 %v248_v1 }
  0x2c   :  { %p221_p5 = por %p220_p4, %p219_p3 }
  0x2e   :  { %155 = vmatpush3.msra.mxu0 %v44_v5  ;;  %p222_p6 = pnand %p221_p5, %p215_p2 }
  0x2f   :  { %157 = vmatmul.mubr.msk.f32.vlgmr.msra.gmra.mrb[0].mxu0 %vm52_vm1, %v41_v6 }
 0x102   :  { %v122_v8 = vpop.f32.mrb[0].mxu0 }
 0x103   :  { %v123_v9 = vadd.f32 %v144_v7, %v122_v8  ;;  %v158_v10 = vpop.f32.mrb[1].mxu0 }
 0x105   :  { %127 = vst.msk [vmem:[#allocation7] sm:$0xf] %vm126_vm2, %v123_v9 }
 0x106   :  { %225 = shalt.err (!%p222_p6)
}
 0x107   :  { %s226_s16 = scalar_lea.hbm %s319_s3, 64 }
 0x108   :  { %p227_p7 = scmp.ne.s32.totalorder %s319_s3, %s226_s16  ;;  %p230_p8 = scmp.lt.u32.totalorder %s226_s16, %s319_s3 }
 0x10a   :  { %p232_p9 = pnand %p230_p8, %p227_p7 }
 0x10c   :  { %235 = shalt.err (!%p232_p9)
}
 0x10d   :  { %137 = dma.vmem_to_hbm [thread:$0]  %s135_s12, 64, %s319_s3, [#allocation4]  }
 0x10e   :  { %240 = dma.done.wait [#allocation4], 64  }
 0x10f   :  { %241 = vsyncadd [#allocation4], 4294967232 }
 0x110   :  { %141 = vsyncpa [#allocation3], 1 }
 0x111   :  { %142 = vsyncpa [#allocation6], 1 }
 0x112   :  { %143 = vsyncpa [#allocation4], 1 }

</bundles_post_ra>
